<compile_context>
chip_gen: v5e
topology: v5e:2x2
jax: 0.10.0
libtpu: 0.0.40
codegen_flags: <defaults>
</compile_context>

<pallas_src>
import jax
import jax.numpy as jnp
from jax.experimental import pallas as pl
from jax.experimental.pallas import tpu as pltpu


# ----------------------------- small helpers -----------------------------

def _round_up(v, m):
    return (v + m - 1) // m * m


def _vmem_capacity_bytes():
    try:
        return int(pltpu.get_tpu_info().vmem_capacity_bytes)
    except Exception:
        return 64 << 20  # conservative (v7x-sized) fallback


def _default_vmem_budget_bytes():
    cap = _vmem_capacity_bytes()
    return max(16 << 20, (cap * 3) // 4)


def _default_min_batch_blocks():
    # Give each TensorCore at least one batch block on multi-core parts (v7x).
    try:
        nc = int(getattr(jax.devices()[0], "num_cores", 1) or 1)
    except Exception:
        nc = 1
    return max(1, min(nc, 2))


def _est_vmem_fused(tm, n_pad, n1_pad, x_item, out_item, im):
    return (2 * tm * n_pad * x_item                     # x tile (x2 buffers, native dtype)
            + 2 * (n_pad * n1_pad + n1_pad * n_pad) * im  # w1, w2 (x2 buffers)
            + 2 * (n1_pad + n_pad) * 4                  # biases f32 (x2 buffers)
            + 2 * tm * n_pad * out_item                 # output tile (x2 buffers)
            + tm * n1_pad * (4 + im)                    # h temp (f32 + bf16 cast)
            + tm * n_pad * 4)                           # decoder f32 result temp


def _est_vmem_tiled(tm, tk, n_pad, x_item, out_item, im):
    return (2 * tm * n_pad * x_item                     # x tile (x2 buffers)
            + 2 * (n_pad * tk + tk * n_pad) * im        # w1, w2 tiles (x2 buffers)
            + 2 * (tk + n_pad) * 4                      # biases f32 (x2 buffers)
            + 2 * tm * n_pad * out_item                 # output tile (x2 buffers)
            + tm * n_pad * 4                            # f32 accumulator scratch
            + tm * tk * (4 + im)                        # h temp (f32 + bf16 cast)
            + tm * n_pad * 4)                           # decoder partial f32 temp


# ------------------------------- kernels ---------------------------------

def _ae_fused_kernel(x_ref, w1_ref, b1_ref, w2_ref, b2_ref, o_ref):
    # x_ref : (tm, n_pad)      native dtype (cast in-kernel)
    # w1_ref: (n_pad, n1_pad)  bf16      b1_ref: (1, n1_pad) f32
    # w2_ref: (n1_pad, n_pad)  bf16      b2_ref: (1, n_pad)  f32
    # o_ref : (tm, n_pad)      x.dtype
    x = x_ref[...].astype(w1_ref.dtype)
    h = jnp.dot(x, w1_ref[...], preferred_element_type=jnp.float32)
    h = jnp.maximum(h + b1_ref[...], 0.0)
    y = jnp.dot(h.astype(w2_ref.dtype), w2_ref[...],
                preferred_element_type=jnp.float32)
    o_ref[...] = (y + b2_ref[...]).astype(o_ref.dtype)


def _make_tiled_kernel(nk):
    """Reduction over n1 split into nk chunks of size tk (grid axis 1)."""

    def kernel(x_ref, w1_ref, b1_ref, w2_ref, b2_ref, o_ref, acc_ref):
        k = pl.program_id(1)
        x = x_ref[...].astype(w1_ref.dtype)
        # Encoder partial tile (tm, tk): bias + ReLU are exact per-k (elementwise over n1).
        h = jnp.dot(x, w1_ref[...], preferred_element_type=jnp.float32)
        h = jnp.maximum(h + b1_ref[...], 0.0)
        # Decoder partial (tm, n_pad), accumulated in f32 over the n1 chunks.
        partial = jnp.dot(h.astype(w2_ref.dtype), w2_ref[...],
                          preferred_element_type=jnp.float32)

        if nk == 1:
            o_ref[...] = (partial + b2_ref[...]).astype(o_ref.dtype)
        else:
            @pl.when(k == 0)
            def _first():
                acc_ref[...] = partial          # direct write: no zero-init pass

            @pl.when(jnp.logical_and(k > 0, k < nk - 1))
            def _middle():
                acc_ref[...] += partial

            @pl.when(k == nk - 1)
            def _last():
                # Fuse last partial + bias + cast straight into the output store.
                o_ref[...] = (acc_ref[...] + partial + b2_ref[...]).astype(o_ref.dtype)

    return kernel


# ------------------------------- wrappers ---------------------------------

def prepare_autoencoder_params(w1, b1, w2, b2, *, matmul_dtype=jnp.bfloat16):
    """Hoisted (once-per-model) weight prep: transpose, pad to 128, cast to bf16.

    w1: (n1, n), b1: (n1,), w2: (n, n1), b2: (n,)  -- torch nn.Linear layout.
    """
    n1, n = w1.shape
    assert w2.shape == (n, n1) and b1.shape == (n1,) and b2.shape == (n,)
    n_pad = _round_up(n, 128)
    n1_pad = _round_up(n1, 128)

    w1_t = w1.T                                    # (n, n1)
    w2_t = w2.T                                    # (n1, n)
    b1_p, b2_p = b1, b2
    if (n_pad, n1_pad) != (n, n1):
        w1_t = jnp.pad(w1_t, ((0, n_pad - n), (0, n1_pad - n1)))
        w2_t = jnp.pad(w2_t, ((0, n1_pad - n1), (0, n_pad - n)))
        b1_p = jnp.pad(b1, (0, n1_pad - n1))       # zero-pad keeps ReLU(0)=0 exact
        b2_p = jnp.pad(b2, (0, n_pad - n))

    return dict(
        w1t=w1_t.astype(matmul_dtype),
        b1=b1_p.astype(jnp.float32).reshape(1, n1_pad),
        w2t=w2_t.astype(matmul_dtype),
        b2=b2_p.astype(jnp.float32).reshape(1, n_pad),
        n=n, n1=n1, n_pad=n_pad, n1_pad=n1_pad,
        matmul_dtype=jnp.dtype(matmul_dtype),
    )


def flattened_autoencoder(x, params, *, t, d, tm_max=512, tk_max=512,
                          min_batch_blocks=None, vmem_budget_bytes=None):
    """Forward pass of FlattenedAutoencoder. x: (B, t, d); params from prepare_autoencoder_params."""
    B = x.shape[0]
    n, n1 = params["n"], params["n1"]
    n_pad, n1_pad = params["n_pad"], params["n1_pad"]
    assert t * d == n, (t, d, n)

    im = params["matmul_dtype"].itemsize
    x_item = jnp.dtype(x.dtype).itemsize
    out_item = x_item

    if min_batch_blocks is None:
        min_batch_blocks = _default_min_batch_blocks()
    if vmem_budget_bytes is None:
        vmem_budget_bytes = _default_vmem_budget_bytes()
    cap = _vmem_capacity_bytes()

    # ---- batch tiling: pad B only to a multiple of 8, pick tm dividing B_pad ----
    B8 = _round_up(B, 8)
    max_blocks = max(1, B8 // 8)

    def retile_batch(tm_cap):
        ni = max(pl.cdiv(B8, max(8, tm_cap)), min(min_batch_blocks, max_blocks))
        ni = min(ni, max_blocks)
        tmv = _round_up(pl.cdiv(B8, ni), 8)
        return ni, tmv, ni * tmv

    num_i, tm, B_pad = retile_batch(tm_max)

    # ---- choose path + auto-shrink tiles to the chip's VMEM budget ----
    use_fused = _est_vmem_fused(tm, n_pad, n1_pad, x_item, out_item, im) <= vmem_budget_bytes

    if use_fused:
        est = _est_vmem_fused(tm, n_pad, n1_pad, x_item, out_item, im)
        tk, nk = n1_pad, 1
        restreams = 1
    else:
        # tk must divide n1_pad (multiple of 128) so no extra weight padding is needed.
        divs = [v for v in range(128, n1_pad + 1, 128) if n1_pad % v == 0]
        tk_cands = [v for v in divs if v <= tk_max]
        tk = max(tk_cands) if tk_cands else 128
        # Shrink tk first (keeps tm, i.e. arithmetic intensity, high), then tm.
        while _est_vmem_tiled(tm, tk, n_pad, x_item, out_item, im) > vmem_budget_bytes:
            smaller = [v for v in divs if v < tk]
            if smaller:
                tk = max(smaller)
            elif tm > 8:
                new = retile_batch(max(8, tm // 2))
                if new[1] >= tm:
                    break
                num_i, tm, B_pad = new
            else:
                break
        nk = n1_pad // tk
        est = _est_vmem_tiled(tm, tk, n_pad, x_item, out_item, im)
        restreams = num_i if nk > 1 else 1

    vmem_limit = int(min(cap, max(est + (4 << 20), 32 << 20)))

    cost = pl.CostEstimate(
        flops=4 * B_pad * n_pad * n1_pad,
        transcendentals=0,
        bytes_accessed=int(B_pad * n_pad * (x_item + out_item)
                           + restreams * 2 * n_pad * n1_pad * im
                           + (n_pad + n1_pad) * 4),
    )

    # ---- pad x (native dtype; cast to bf16 happens inside the kernel) ----
    x_flat = x.reshape(B, n)                               # == torch x.view(B, -1)
    if (B_pad, n_pad) != (B, n):
        x_flat = jnp.pad(x_flat, ((0, B_pad - B), (0, n_pad - n)))

    # ---- launch ----
    if use_fused:
        grid_spec = pltpu.PrefetchScalarGridSpec(
            num_scalar_prefetch=0,
            grid=(num_i,),
            in_specs=[
                pl.BlockSpec((tm, n_pad), lambda i: (i, 0)),       # x tile
                pl.BlockSpec((n_pad, n1_pad), lambda i: (0, 0)),   # w1 (fetched once)
                pl.BlockSpec((1, n1_pad), lambda i: (0, 0)),       # b1
                pl.BlockSpec((n1_pad, n_pad), lambda i: (0, 0)),   # w2 (fetched once)
                pl.BlockSpec((1, n_pad), lambda i: (0, 0)),        # b2
            ],
            out_specs=pl.BlockSpec((tm, n_pad), lambda i: (i, 0)), # lane-dense output
        )
        out_p = pl.pallas_call(
            _ae_fused_kernel,
            out_shape=jax.ShapeDtypeStruct((B_pad, n_pad), x.dtype),
            grid_spec=grid_spec,
            compiler_params=pltpu.CompilerParams(
                dimension_semantics=("parallel",),
                vmem_limit_bytes=vmem_limit,
            ),
            cost_estimate=cost,
        )(x_flat, params["w1t"], params["b1"], params["w2t"], params["b2"])
    else:
        grid_spec = pltpu.PrefetchScalarGridSpec(
            num_scalar_prefetch=0,
            grid=(num_i, nk),                                       # batch outer, n1 reduction last
            in_specs=[
                pl.BlockSpec((tm, n_pad), lambda i, k: (i, 0)),     # x tile
                pl.BlockSpec((n_pad, tk), lambda i, k: (0, k)),     # w1 tile
                pl.BlockSpec((1, tk), lambda i, k: (0, k)),         # b1 tile
                pl.BlockSpec((tk, n_pad), lambda i, k: (k, 0)),     # w2 tile
                pl.BlockSpec((1, n_pad), lambda i, k: (0, 0)),      # b2 (full)
            ],
            out_specs=pl.BlockSpec((tm, n_pad), lambda i, k: (i, 0)),
            scratch_shapes=[pltpu.VMEM((tm, n_pad), jnp.float32)],
        )
        out_p = pl.pallas_call(
            _make_tiled_kernel(nk),
            out_shape=jax.ShapeDtypeStruct((B_pad, n_pad), x.dtype),
            grid_spec=grid_spec,
            compiler_params=pltpu.CompilerParams(
                dimension_semantics=("parallel", "arbitrary"),
                vmem_limit_bytes=vmem_limit,
            ),
            cost_estimate=cost,
        )(x_flat, params["w1t"], params["b1"], params["w2t"], params["b2"])

    out = out_p
    if (B_pad, n_pad) != (B, n):
        out = out[:B, :n]
    return out.reshape(B, t, d)                             # == torch x.view(B, t, d)


# ---------------------------- test helpers ----------------------------

def _init_linear(key, out_features, in_features, dtype=jnp.float32):
    """Deterministic init mimicking torch.nn.Linear's U(-1/sqrt(in), 1/sqrt(in))."""
    kw, kb = jax.random.split(key)
    bound = 1.0 / (in_features ** 0.5)
    w = jax.random.uniform(kw, (out_features, in_features), dtype, -bound, bound)
    b = jax.random.uniform(kb, (out_features,), dtype, -bound, bound)
    return w, b


def _reference_f32(x, w1, b1, w2, b2, t, d):
    B = x.shape[0]
    xf = x.reshape(B, -1)
    h = jnp.maximum(xf @ w1.T + b1, 0.0)
    return (h @ w2.T + b2).reshape(B, t, d)


def _reference_bf16(x, w1, b1, w2, b2, t, d):
    """Mirrors the kernel numerics: bf16 matmul inputs, f32 accumulate/elementwise."""
    B = x.shape[0]
    xf = x.reshape(B, -1).astype(jnp.bfloat16)
    h = jnp.dot(xf, w1.T.astype(jnp.bfloat16), preferred_element_type=jnp.float32)
    h = jnp.maximum(h + b1, 0.0)
    y = jnp.dot(h.astype(jnp.bfloat16), w2.T.astype(jnp.bfloat16),
                preferred_element_type=jnp.float32) + b2
    return y.astype(x.dtype).reshape(B, t, d)


if __name__ == "__main__":
    key = jax.random.PRNGKey(0)
    kx1, ke1, kd1, kx2, ke2, kd2 = jax.random.split(key, 6)

    # ---- Case 1: the module's toy size (d=4, t=8 -> n=32; hidden n1=32; B=2). ----
    # Small enough that the weights-resident fused path is used.
    d, t, n1 = 4, 8, 32
    n = d * t
    B = 2
    x = jax.random.normal(kx1, (B, t, d), dtype=jnp.float32)
    w1, b1 = _init_linear(ke1, n1, n)     # encoder Linear(n -> n1)
    w2, b2 = _init_linear(kd1, n, n1)     # decoder Linear(n1 -> n)
    params = prepare_autoencoder_params(w1, b1, w2, b2)

    out = jax.block_until_ready(flattened_autoencoder(x, params, t=t, d=d))
    assert out.shape == (B, t, d), out.shape
    assert jnp.allclose(out, _reference_bf16(x, w1, b1, w2, b2, t, d),
                        atol=1e-3, rtol=1e-3), "case 1: mismatch vs bf16 reference"
    assert jnp.allclose(out, _reference_f32(x, w1, b1, w2, b2, t, d),
                        atol=3e-2, rtol=3e-2), "case 1: mismatch vs f32 reference"

    # ---- Case 2: larger shapes with an artificially tiny VMEM budget so the ----
    # ---- tiled-reduction (multi-k accumulate) path is exercised as well.    ----
    d2, t2, n1_2 = 16, 16, 512
    n2 = d2 * t2
    B2 = 64
    x2 = jax.random.normal(kx2, (B2, t2, d2), dtype=jnp.float32)
    w1_2, b1_2 = _init_linear(ke2, n1_2, n2)
    w2_2, b2_2 = _init_linear(kd2, n2, n1_2)
    params2 = prepare_autoencoder_params(w1_2, b1_2, w2_2, b2_2)

    out2 = jax.block_until_ready(
        flattened_autoencoder(x2, params2, t=t2, d=d2,
                              tk_max=128, vmem_budget_bytes=1 << 20))
    assert out2.shape == (B2, t2, d2), out2.shape
    assert jnp.allclose(out2, _reference_bf16(x2, w1_2, b1_2, w2_2, b2_2, t2, d2),
                        atol=5e-3, rtol=5e-3), "case 2: mismatch vs bf16 reference"
    assert jnp.allclose(out2, _reference_f32(x2, w1_2, b1_2, w2_2, b2_2, t2, d2),
                        atol=5e-2, rtol=5e-2), "case 2: mismatch vs f32 reference"

    print("KERNEL_OK")
</pallas_src>

<mosaic_0001>
module attributes {stable_mosaic.version = 11 : i64} {
  func.func @_ae_fused_kernel(%arg0: i32, %arg1: memref<8x128xf32, #tpu.memory_space<vmem>>, %arg2: memref<128x128xbf16, #tpu.memory_space<vmem>>, %arg3: memref<1x128xf32, #tpu.memory_space<vmem>>, %arg4: memref<128x128xbf16, #tpu.memory_space<vmem>>, %arg5: memref<1x128xf32, #tpu.memory_space<vmem>>, %arg6: memref<8x128xf32, #tpu.memory_space<vmem>>) attributes {dimension_semantics = [#tpu.dimension_semantics<parallel>], iteration_bounds = array<i64: 1>, scalar_prefetch = 0 : i64, scratch_operands = 0 : i64, tpu.core_type = #tpu.core_type<tc>, window_params = [{transform_indices = @transform_0, window_bounds = array<i64: 8, 128>}, {pipeline_mode = #tpu.pipeline_mode<synchronous>, transform_indices = @transform_1, window_bounds = array<i64: 128, 128>}, {pipeline_mode = #tpu.pipeline_mode<synchronous>, transform_indices = @transform_2, window_bounds = array<i64: 1, 128>}, {pipeline_mode = #tpu.pipeline_mode<synchronous>, transform_indices = @transform_3, window_bounds = array<i64: 128, 128>}, {pipeline_mode = #tpu.pipeline_mode<synchronous>, transform_indices = @transform_4, window_bounds = array<i64: 1, 128>}, {transform_indices = @transform_5, window_bounds = array<i64: 8, 128>}]} {
    %c0 = arith.constant 0 : index
    %c0_0 = arith.constant 0 : index
    %0 = vector.load %arg1[%c0, %c0_0] : memref<8x128xf32, #tpu.memory_space<vmem>>, vector<8x128xf32>
    %1 = arith.truncf %0 : vector<8x128xf32> to vector<8x128xbf16>
    %c0_1 = arith.constant 0 : index
    %c0_2 = arith.constant 0 : index
    %2 = vector.load %arg2[%c0_1, %c0_2] : memref<128x128xbf16, #tpu.memory_space<vmem>>, vector<128x128xbf16>
    %cst = arith.constant dense<0.000000e+00> : vector<8x128xf32>
    %3 = tpu.matmul %1, %2, %cst {dimension_numbers = #tpu.dot_dimension_numbers<[1], [0], [0], [1], [0, 0, 1, 1], [], []>} : vector<8x128xbf16>, vector<128x128xbf16>, vector<8x128xf32> -> vector<8x128xf32>
    %c0_3 = arith.constant 0 : index
    %c0_4 = arith.constant 0 : index
    %4 = vector.load %arg3[%c0_3, %c0_4] : memref<1x128xf32, #tpu.memory_space<vmem>>, vector<1x128xf32>
    %5 = vector.broadcast %4 : vector<1x128xf32> to vector<8x128xf32>
    %6 = arith.addf %3, %5 : vector<8x128xf32>
    %cst_5 = arith.constant 0.000000e+00 : f32
    %7 = vector.broadcast %cst_5 : f32 to vector<8x128xf32>
    %8 = arith.maximumf %6, %7 : vector<8x128xf32>
    %9 = arith.truncf %8 : vector<8x128xf32> to vector<8x128xbf16>
    %c0_6 = arith.constant 0 : index
    %c0_7 = arith.constant 0 : index
    %10 = vector.load %arg4[%c0_6, %c0_7] : memref<128x128xbf16, #tpu.memory_space<vmem>>, vector<128x128xbf16>
    %cst_8 = arith.constant dense<0.000000e+00> : vector<8x128xf32>
    %11 = tpu.matmul %9, %10, %cst_8 {dimension_numbers = #tpu.dot_dimension_numbers<[1], [0], [0], [1], [0, 0, 1, 1], [], []>} : vector<8x128xbf16>, vector<128x128xbf16>, vector<8x128xf32> -> vector<8x128xf32>
    %c0_9 = arith.constant 0 : index
    %c0_10 = arith.constant 0 : index
    %12 = vector.load %arg5[%c0_9, %c0_10] : memref<1x128xf32, #tpu.memory_space<vmem>>, vector<1x128xf32>
    %13 = vector.broadcast %12 : vector<1x128xf32> to vector<8x128xf32>
    %14 = arith.addf %11, %13 : vector<8x128xf32>
    %c0_11 = arith.constant 0 : index
    %c0_12 = arith.constant 0 : index
    %15 = vector.load %arg6[%c0_11, %c0_12] : memref<8x128xf32, #tpu.memory_space<vmem>>, vector<8x128xf32>
    tpu.vector_store %arg6[%c0_11, %c0_12], %14 {strides = array<i32>} : memref<8x128xf32, #tpu.memory_space<vmem>>, vector<8x128xf32>,
    return
  }
  func.func @transform_0(%arg0: i32) -> (i32, i32) {
    %c0_i32 = arith.constant 0 : i32
    %c0_i32_0 = arith.constant 0 : i32
    return %arg0, %c0_i32 : i32, i32
  }
  func.func @transform_1(%arg0: i32) -> (i32, i32) {
    %c0_i32 = arith.constant 0 : i32
    %c0_i32_0 = arith.constant 0 : i32
    %c0_i32_1 = arith.constant 0 : i32
    return %c0_i32, %c0_i32_0 : i32, i32
  }
  func.func @transform_2(%arg0: i32) -> (i32, i32) {
    %c0_i32 = arith.constant 0 : i32
    %c0_i32_0 = arith.constant 0 : i32
    %c0_i32_1 = arith.constant 0 : i32
    return %c0_i32, %c0_i32_0 : i32, i32
  }
  func.func @transform_3(%arg0: i32) -> (i32, i32) {
    %c0_i32 = arith.constant 0 : i32
    %c0_i32_0 = arith.constant 0 : i32
    %c0_i32_1 = arith.constant 0 : i32
    return %c0_i32, %c0_i32_0 : i32, i32
  }
  func.func @transform_4(%arg0: i32) -> (i32, i32) {
    %c0_i32 = arith.constant 0 : i32
    %c0_i32_0 = arith.constant 0 : i32
    %c0_i32_1 = arith.constant 0 : i32
    return %c0_i32, %c0_i32_0 : i32, i32
  }
  func.func @transform_5(%arg0: i32) -> (i32, i32) {
    %c0_i32 = arith.constant 0 : i32
    %c0_i32_0 = arith.constant 0 : i32
    return %arg0, %c0_i32 : i32, i32
  }
}

</mosaic_0001>

<bundles_post_ra>
// kernel: tpu_custom_call.1
= control target key start
LH: loop header
LB: loop body
LE: loop exit
PB: predicated region body
PF: predicated region fallthrough
CT: control target
= control target key end

     0   :  { %10 = vsyncpa [#allocation3], 0  ;;  %s495_s0 = inlined_call_operand.hbm [shape: f32[8,128], index: 0, kind: input, shape index: {}]   ;;  %s496_s1 = inlined_call_operand.hbm [shape: bf16[128,128], index: 1, kind: input, shape index: {}]   ;;  %s497_s2 = inlined_call_operand.vmem [shape: f32[1,128], index: 2, kind: input, shape index: {}]   ;;  %s498_s3 = inlined_call_operand.hbm [shape: bf16[128,128], index: 3, kind: input, shape index: {}]   ;;  %s499_s4 = inlined_call_operand.vmem [shape: f32[1,128], index: 4, kind: input, shape index: {}]   ;;  %s500_s5 = inlined_call_operand.hbm [shape: f32[8,128], index: 5, kind: output, shape index: {}]  }
   0x1   :  { %11 = vsyncpa [#allocation6], 0  ;;  %s28_s20 = sshll.u32 %s496_s1, 4  ;;  %s29_s20 = int_to_ptr.hbm [resolvable:$true] %s28_s20 }
   0x2   :  { %12 = vsyncpa [#allocation4], 0  ;;  %s441_s21 = smov [#allocation5]   ;;  %s18_s25 = sshll.u32 %s495_s0, 4  ;;  %s19_s25 = int_to_ptr.hbm [resolvable:$true] %s18_s25 }
   0x3   :  { %s30_s22 = sshll.u32 %s441_s21, 4  ;;  %s442_s26 = smov 64   ;;  %s31_s22 = int_to_ptr.vmem [resolvable:$true] %s30_s22 }
   0x4   :  { %s443_s27 = smov 4   ;;  %s444_s28 = smov [#allocation2]  }
   0x5   :  { %36 = dma.hbm_to_vmem [thread:$0]  %s29_s20, 1024, %s31_s22, [#allocation6], %s442_s26, %s442_s26, %s443_s27  }
   0x6   :  { %s20_s29 = sshll.u32 %s444_s28, 4  ;;  %s43_s7 = sshll.u32 %s498_s3, 4  ;;  %s21_s29 = int_to_ptr.vmem [resolvable:$true] %s20_s29  ;;  %s44_s7 = int_to_ptr.hbm [resolvable:$true] %s43_s7 }
   0x7   :  { %23 = dma.hbm_to_vmem [thread:$0]  %s19_s25, 128, %s21_s29, [#allocation3]  }
   0x8   :  { %s445_s1 = smov [#allocation7]  }
   0x9   :  { %s45_s8 = sshll.u32 %s445_s1, 4  ;;  %s46_s8 = int_to_ptr.vmem [resolvable:$true] %s45_s8 }
   0xa   :  { %51 = dma.hbm_to_vmem [thread:$0]  %s44_s7, 1024, %s46_s8, [#allocation6], %s442_s26, %s442_s26, %s443_s27  }
   0xb   :  { %435 = dma.done.wait [#allocation3], 128  }
   0xc   :  { %436 = vsyncadd [#allocation3], 4294967168 }
   0xd   :  { %437 = dma.done.wait [#allocation6], 2048  }
   0xe   :  { %438 = vsyncadd [#allocation6], 4294965248  ;;  %v322_v0 = vld [vmem:[#allocation5 + $0x38] sm:$0xff]  ;;  %v321_v1 = vld [vmem:[#allocation5 + $0x30] sm:$0xff]  ;;  %s446_s11 = smov [#allocation8]   ;;  %s240_s15 = sshll.u32 %s500_s5, 4  ;;  %s241_s15 = int_to_ptr.hbm [resolvable:$true] %s240_s15 }
   0xf   :  { %136 = vmatpush.bf16.msra.mxu0 %v322_v0  ;;  %v330_v2 = vld [vmem:[#allocation7 + $0x38] sm:$0xff]  ;;  %v329_v3 = vld [vmem:[#allocation7 + $0x30] sm:$0xff]  ;;  %v320_v4 = vld [vmem:[#allocation5 + $0x28] sm:$0xff]  ;;  %s238_s12 = sshll.u32 %s446_s11, 4  ;;  %s239_s12 = int_to_ptr.vmem [resolvable:$true] %s238_s12 }
  0x10   :  { %219 = vmatpush.bf16.msra.mxu1 %v330_v2  ;;  %v328_v5 = vld [vmem:[#allocation7 + $0x28] sm:$0xff]  ;;  %v319_v6 = vld [vmem:[#allocation5 + $0x20] sm:$0xff]  ;;  %v318_v8 = vld [vmem:[#allocation5 + $0x18] sm:$0xff] }
  0x11   :  { %v327_v7 = vld [vmem:[#allocation7 + $0x20] sm:$0xff]  ;;  %v326_v9 = vld [vmem:[#allocation7 + $0x18] sm:$0xff]  ;;  %v317_v10 = vld [vmem:[#allocation5 + $0x10] sm:$0xff] }
  0x12   :  { %v325_v11 = vld [vmem:[#allocation7 + $0x10] sm:$0xff]  ;;  %v316_v12 = vld [vmem:[#allocation5 + $0x8] sm:$0xff]  ;;  %v315_v13 = vld [vmem:[#allocation5] sm:$0xff] }
  0x13   :  { %137 = vmatpush.bf16.msra.mxu0 %v321_v1  ;;  %v66_v14 = vld [vmem:[#allocation2] sm:$0xff]  ;;  %v324_v16 = vld [vmem:[#allocation7 + $0x8] sm:$0xff]  ;;  %v323_v17 = vld [vmem:[#allocation7] sm:$0xff] }
  0x14   :  { %220 = vmatpush.bf16.msra.mxu1 %v329_v3  ;;  %v67_v15 = vpack.c.bf16 %v66_v14, %v66_v14  ;;  %v337_v18 = vld [vmem:[%s497_s2] ss:$0 sm:$0xff] }
  0x15   :  { %v338_v24 = vld [vmem:[%s499_s4] ss:$0 sm:$0xff] }
  0x17   :  { %138 = vmatpush.bf16.msra.mxu0 %v320_v4 }
  0x18   :  { %221 = vmatpush.bf16.msra.mxu1 %v328_v5 }
  0x1b   :  { %139 = vmatpush.bf16.msra.mxu0 %v319_v6 }
  0x1c   :  { %222 = vmatpush.bf16.msra.mxu1 %v327_v7 }
  0x1f   :  { %140 = vmatpush.bf16.msra.mxu0 %v318_v8 }
  0x20   :  { %223 = vmatpush.bf16.msra.mxu1 %v326_v9 }
  0x23   :  { %141 = vmatpush.bf16.msra.mxu0 %v317_v10 }
  0x24   :  { %224 = vmatpush.bf16.msra.mxu1 %v325_v11 }
  0x27   :  { %142 = vmatpush.bf16.msra.mxu0 %v316_v12 }
  0x28   :  { %225 = vmatpush.bf16.msra.mxu1 %v324_v16 }
  0x2b   :  { %143 = vmatpush.bf16.msra.mxu0 %v315_v13 }
  0x2c   :  { %226 = vmatpush.bf16.msra.mxu1 %v323_v17 }
  0x2e   :  { %144 = vmatmul.bf16.vlgmr.msra.gmra.mxu0 %v67_v15 }
  0xab   :  { %v145_v19 = vpop.f32.mrf.mxu0 }
  0xac   :  { %v146_v20 = vadd.f32 %v337_v18, %v145_v19 }
  0xae   :  { %v149_v21 = vmax.f32 %v146_v20, 0.0 }
  0xb0   :  { %v150_v22 = vpack.c.bf16 %v149_v21, %v149_v21 }
  0xb2   :  { %227 = vmatmul.bf16.vlgmr.msra.gmra.mxu1 %v150_v22 }
  0xb3   :  { %v147_v23 = vpop.f32.mrf.mxu0 }
 0x12f   :  { %v228_v25 = vpop.f32.mrf.mxu1 }
 0x130   :  { %v229_v26 = vadd.f32 %v338_v24, %v228_v25 }
 0x132   :  { %232 = vst [vmem:[#allocation8] sm:$0xff] %v229_v26 }
 0x133   :  { %243 = dma.vmem_to_hbm [thread:$0]  %s239_s12, 128, %s241_s15, [#allocation4]  }
 0x137   :  { %v230_v27 = vpop.f32.mrf.mxu1 }
 0x138   :  { %439 = dma.done.wait [#allocation4], 128  }
 0x139   :  { %440 = vsyncadd [#allocation4], 4294967168 }
 0x13a   :  { %248 = vsyncpa [#allocation3], 1 }
 0x13b   :  { %249 = vsyncpa [#allocation6], 1 }
 0x13c   :  { %250 = vsyncpa [#allocation4], 1 }

</bundles_post_ra>
